<compile_context>
chip_gen: v5e
topology: v5e:2x2
jax: 0.10.0
libtpu: 0.0.40
codegen_flags: <defaults>
</compile_context>

<pallas_src>
import jax
import jax.numpy as jnp
from jax.experimental import pallas as pl
from jax.experimental.pallas import tpu as pltpu


def graphconv_kernel(xT_ref, adjT_ref, w_ref, b_ref, oT_ref, h_ref):
    # xT_ref : (Bt*Fp, Np)    x^T, batch folded into sublane rows
    # adjT_ref: (Np, Np)      A^T (zero padded)
    # w_ref  : (C, 3*Fp)      [W0 - W2 + Ws | W1 | 2*W2]  (host-folded weights)
    # b_ref  : (C, 1)         bias column (f32)
    # oT_ref : (C, Bt*Np)     out^T, batches stacked along the lane axis
    # h_ref  : (3*Fp, Bt*Np)  VMEM scratch holding [T0; T1; A@T1] lane-stacked
    btf, np_ = xT_ref.shape
    fp = h_ref.shape[0] // 3
    bt = btf // fp
    dt = xT_ref.dtype

    adj_t = adjT_ref[...]
    t0 = xT_ref[...]

    # ---- Chebyshev recursion: one MXU dot per step for ALL batches ----
    #   T1^T = T0^T @ A^T ,   U^T = T1^T @ A^T   (U = A @ T1)
    t1 = jnp.dot(t0, adj_t, preferred_element_type=jnp.float32).astype(dt)
    u = jnp.dot(t1, adj_t, preferred_element_type=jnp.float32).astype(dt)

    # ---- re-layout batch-folded rows -> (3F, Bt*N) lane-stacked scratch ----
    # All slices are static and (8,128)-tile aligned (Fp % 8 == 0,
    # Np % 128 == 0): plain vld/vst copies, no carried accumulators.
    for b in range(bt):
        rows = slice(b * fp, (b + 1) * fp)
        cols = slice(b * np_, (b + 1) * np_)
        h_ref[0:fp, cols] = t0[rows, :]
        h_ref[fp:2 * fp, cols] = t1[rows, :]
        h_ref[2 * fp:3 * fp, cols] = u[rows, :]

    # ---- fused projection: ONE (C,3F) @ (3F, Bt*N) dot + f32 epilogue ----
    acc = jnp.dot(w_ref[...], h_ref[...], preferred_element_type=jnp.float32)
    acc = acc + b_ref[...].astype(jnp.float32)          # (C,1) -> (C, Bt*N)
    oT_ref[...] = jnp.maximum(acc, 0.0).astype(oT_ref.dtype)   # relu


def _round_up(x, m):
    return ((x + m - 1) // m) * m


def _vmem_limit_bytes():
    # Size the scoped VMEM limit per generation: capacity minus headroom,
    # capped at 100 MiB (v5e/v6e have 128 MiB physical, v7x 64 MiB).
    try:
        cap = int(pltpu.get_tpu_info().vmem_capacity_bytes)
        return int(min(cap - (8 << 20), 100 << 20))
    except Exception:
        return None


def graph_conv(x, adj, w_conv, w_self, b_self, *, batch_block=None,
               compute_dtype=None):
    """Forward of GraphConv.cheb_conv (2-D adjacency, K=3, with_self, relu).

    x: (B, N, F); adj: (N, N); w_conv: (C, 3F); w_self: (C, F); b_self: (C,)
    Returns (B, N, C).
    """
    B, N, F = x.shape
    C = w_conv.shape[0]
    K = 3
    assert adj.shape == (N, N)
    assert w_conv.shape == (C, K * F)
    assert w_self.shape == (C, F)
    assert b_self.shape == (C,)

    dt = jnp.dtype(compute_dtype) if compute_dtype is not None else x.dtype
    sub = 8 if dt == jnp.float32 else 16
    Fp = _round_up(F, sub)           # sublane-pack aligned feature dim
    Np = _round_up(N, 128)           # lane-dense node dim

    # Default: fold the whole batch into one grid step (best on 1-TC chips).
    # On v7x pass batch_block so grid = B // Bt is a multiple of 2.
    Bt = B if batch_block is None else int(batch_block)
    assert B % Bt == 0, "batch_block must divide the batch size"

    # ---- host-side constant folding (zero runtime cost) ----
    #   T2 = 2*A@T1 - T0  =>  out = T0@(W0-W2+Ws)^T + T1@W1^T + (A@T1)@(2W2)^T + b
    w0 = w_conv[:, :F]
    w1 = w_conv[:, F:2 * F]
    w2 = w_conv[:, 2 * F:]
    m0 = w0 - w2 + w_self
    m1 = w1
    m2 = 2.0 * w2
    w_fused = jnp.zeros((C, 3 * Fp), dtype=dt)
    w_fused = w_fused.at[:, 0:F].set(m0.astype(dt))
    w_fused = w_fused.at[:, Fp:Fp + F].set(m1.astype(dt))
    w_fused = w_fused.at[:, 2 * Fp:2 * Fp + F].set(m2.astype(dt))
    b_col = b_self.reshape(C, 1).astype(jnp.float32)

    # ---- transposed, padded, lane-dense layouts (XLA-side plumbing) ----
    xT = jnp.transpose(x, (0, 2, 1)).astype(dt)                 # (B, F, N)
    xT = jnp.pad(xT, ((0, 0), (0, Fp - F), (0, Np - N)))
    x2d = xT.reshape(B * Fp, Np)                                # rows = (batch, feat)
    adj_t = jnp.pad(jnp.transpose(adj).astype(dt),
                    ((0, Np - N), (0, Np - N)))

    itm = jnp.dtype(dt).itemsize
    flops = 4 * B * Fp * Np * Np + 6 * C * Fp * B * Np
    bytes_accessed = (x2d.size * itm + adj_t.size * itm + w_fused.size * itm
                      + b_col.size * 4
                      + C * B * Np * jnp.dtype(x.dtype).itemsize)

    outT = pl.pallas_call(
        graphconv_kernel,
        out_shape=jax.ShapeDtypeStruct((C, B * Np), x.dtype),
        grid_spec=pltpu.PrefetchScalarGridSpec(
            num_scalar_prefetch=0,
            grid=(B // Bt,),
            in_specs=[
                # x^T, batch-tiled along the grid
                pl.BlockSpec((Bt * Fp, Np), lambda i: (i, 0)),
                # grid-invariant operands: single-buffered
                pl.BlockSpec((Np, Np), lambda i: (0, 0),
                             pipeline_mode=pl.Buffered(1)),
                pl.BlockSpec((C, 3 * Fp), lambda i: (0, 0),
                             pipeline_mode=pl.Buffered(1)),
                pl.BlockSpec((C, 1), lambda i: (0, 0),
                             pipeline_mode=pl.Buffered(1)),
            ],
            out_specs=pl.BlockSpec((C, Bt * Np), lambda i: (0, i)),
            scratch_shapes=[pltpu.VMEM((3 * Fp, Bt * Np), dt)],
        ),
        compiler_params=pltpu.CompilerParams(
            dimension_semantics=("parallel",),
            vmem_limit_bytes=_vmem_limit_bytes()),
        cost_estimate=pl.CostEstimate(
            flops=int(flops), transcendentals=0,
            bytes_accessed=int(bytes_accessed)),
    )(x2d, adj_t, w_fused, b_col)

    out = outT.reshape(C, B, Np)[:, :, :N]        # drop node padding
    return jnp.transpose(out, (1, 2, 0))          # (B, N, C)


def graph_conv_ref(x, adj, w_conv, w_self, b_self):
    """Pure-JAX reference of GraphConv.cheb_conv (2-D adjacency, K=3)."""
    t0 = x
    t1 = jnp.einsum("ij,bjf->bif", adj, t0)
    t2 = 2.0 * jnp.einsum("ij,bjf->bif", adj, t1) - t0
    h = jnp.concatenate([t0, t1, t2], axis=-1)
    out = h @ w_conv.T + (x @ w_self.T + b_self)
    return jax.nn.relu(out)


if __name__ == "__main__":
    K = 3
    key = jax.random.PRNGKey(0)

    # --- case 1: module-consistent small shapes, single grid step ---
    B, N, F, C = 2, 16, 8, 32
    kx, ka, kwc, kws, kb, key = jax.random.split(key, 6)
    x = jax.random.normal(kx, (B, N, F), dtype=jnp.float32)
    adj = jax.random.normal(ka, (N, N), dtype=jnp.float32) * 0.1
    bound_c = 1.0 / (F * K) ** 0.5
    bound_s = 1.0 / F ** 0.5
    w_conv = jax.random.uniform(kwc, (C, F * K), jnp.float32, -bound_c, bound_c)
    w_self = jax.random.uniform(kws, (C, F), jnp.float32, -bound_s, bound_s)
    b_self = jax.random.uniform(kb, (C,), jnp.float32, -bound_s, bound_s)

    out = jax.block_until_ready(graph_conv(x, adj, w_conv, w_self, b_self))
    ref = graph_conv_ref(x, adj, w_conv, w_self, b_self)
    assert out.shape == (B, N, C)
    assert jnp.allclose(out, ref, atol=1e-4, rtol=1e-4), "case-1 mismatch"

    # --- case 2: exercises N/F padding + multi-step parallel grid ---
    B2, N2, F2, C2 = 4, 40, 12, 16
    kx, ka, kwc, kws, kb, key = jax.random.split(key, 6)
    x2 = jax.random.normal(kx, (B2, N2, F2), dtype=jnp.float32)
    adj2 = jax.random.normal(ka, (N2, N2), dtype=jnp.float32) * 0.05
    bound_c = 1.0 / (F2 * K) ** 0.5
    bound_s = 1.0 / F2 ** 0.5
    wc2 = jax.random.uniform(kwc, (C2, F2 * K), jnp.float32, -bound_c, bound_c)
    ws2 = jax.random.uniform(kws, (C2, F2), jnp.float32, -bound_s, bound_s)
    bs2 = jax.random.uniform(kb, (C2,), jnp.float32, -bound_s, bound_s)

    out2 = jax.block_until_ready(
        graph_conv(x2, adj2, wc2, ws2, bs2, batch_block=2))
    ref2 = graph_conv_ref(x2, adj2, wc2, ws2, bs2)
    assert out2.shape == (B2, N2, C2)
    assert jnp.allclose(out2, ref2, atol=1e-4, rtol=1e-4), "case-2 mismatch"

    print("KERNEL_OK")
</pallas_src>

<mosaic_0001>
module attributes {stable_mosaic.version = 11 : i64} {
  func.func @graphconv_kernel(%arg0: i32, %arg1: memref<16x128xf32, #tpu.memory_space<vmem>>, %arg2: memref<128x128xf32, #tpu.memory_space<vmem>>, %arg3: memref<32x24xf32, #tpu.memory_space<vmem>>, %arg4: memref<32x1xf32, #tpu.memory_space<vmem>>, %arg5: memref<32x256xf32, #tpu.memory_space<vmem>>, %arg6: memref<24x256xf32, #tpu.memory_space<vmem>>) attributes {dimension_semantics = [#tpu.dimension_semantics<parallel>], iteration_bounds = array<i64: 1>, scalar_prefetch = 0 : i64, scratch_operands = 1 : i64, tpu.core_type = #tpu.core_type<tc>, window_params = [{transform_indices = @transform_0, window_bounds = array<i64: 16, 128>}, {pipeline_mode = #tpu.pipeline_mode<synchronous>, transform_indices = @transform_1, window_bounds = array<i64: 128, 128>}, {pipeline_mode = #tpu.pipeline_mode<synchronous>, transform_indices = @transform_2, window_bounds = array<i64: 32, 24>}, {pipeline_mode = #tpu.pipeline_mode<synchronous>, transform_indices = @transform_3, window_bounds = array<i64: 32, 1>}, {transform_indices = @transform_4, window_bounds = array<i64: 32, 256>}]} {
    %c0 = arith.constant 0 : index
    %c0_0 = arith.constant 0 : index
    %0 = vector.load %arg2[%c0, %c0_0] : memref<128x128xf32, #tpu.memory_space<vmem>>, vector<128x128xf32>
    %c0_1 = arith.constant 0 : index
    %c0_2 = arith.constant 0 : index
    %1 = vector.load %arg1[%c0_1, %c0_2] : memref<16x128xf32, #tpu.memory_space<vmem>>, vector<16x128xf32>
    %cst = arith.constant dense<0.000000e+00> : vector<16x128xf32>
    %2 = tpu.matmul %1, %0, %cst {dimension_numbers = #tpu.dot_dimension_numbers<[1], [0], [0], [1], [0, 0, 1, 1], [], []>} : vector<16x128xf32>, vector<128x128xf32>, vector<16x128xf32> -> vector<16x128xf32>
    %cst_3 = arith.constant dense<0.000000e+00> : vector<16x128xf32>
    %3 = tpu.matmul %2, %0, %cst_3 {dimension_numbers = #tpu.dot_dimension_numbers<[1], [0], [0], [1], [0, 0, 1, 1], [], []>} : vector<16x128xf32>, vector<128x128xf32>, vector<16x128xf32> -> vector<16x128xf32>
    %4 = vector.extract_strided_slice %1 {offsets = [0, 0], sizes = [8, 128], strides = [1, 1]} : vector<16x128xf32> to vector<8x128xf32>
    %c0_4 = arith.constant 0 : index
    %c0_5 = arith.constant 0 : index
    %5 = vector.load %arg6[%c0_4, %c0_5] : memref<24x256xf32, #tpu.memory_space<vmem>>, vector<8x128xf32>
    tpu.vector_store %arg6[%c0_4, %c0_5], %4 {strides = array<i32>} : memref<24x256xf32, #tpu.memory_space<vmem>>, vector<8x128xf32>,
    %6 = vector.extract_strided_slice %2 {offsets = [0, 0], sizes = [8, 128], strides = [1, 1]} : vector<16x128xf32> to vector<8x128xf32>
    %c8 = arith.constant 8 : index
    %c0_6 = arith.constant 0 : index
    %7 = vector.load %arg6[%c8, %c0_6] : memref<24x256xf32, #tpu.memory_space<vmem>>, vector<8x128xf32>
    tpu.vector_store %arg6[%c8, %c0_6], %6 {strides = array<i32>} : memref<24x256xf32, #tpu.memory_space<vmem>>, vector<8x128xf32>,
    %8 = vector.extract_strided_slice %3 {offsets = [0, 0], sizes = [8, 128], strides = [1, 1]} : vector<16x128xf32> to vector<8x128xf32>
    %c16 = arith.constant 16 : index
    %c0_7 = arith.constant 0 : index
    %9 = vector.load %arg6[%c16, %c0_7] : memref<24x256xf32, #tpu.memory_space<vmem>>, vector<8x128xf32>
    tpu.vector_store %arg6[%c16, %c0_7], %8 {strides = array<i32>} : memref<24x256xf32, #tpu.memory_space<vmem>>, vector<8x128xf32>,
    %10 = vector.extract_strided_slice %1 {offsets = [8, 0], sizes = [8, 128], strides = [1, 1]} : vector<16x128xf32> to vector<8x128xf32>
    %c0_8 = arith.constant 0 : index
    %c128 = arith.constant 128 : index
    %11 = vector.load %arg6[%c0_8, %c128] : memref<24x256xf32, #tpu.memory_space<vmem>>, vector<8x128xf32>
    tpu.vector_store %arg6[%c0_8, %c128], %10 {strides = array<i32>} : memref<24x256xf32, #tpu.memory_space<vmem>>, vector<8x128xf32>,
    %12 = vector.extract_strided_slice %2 {offsets = [8, 0], sizes = [8, 128], strides = [1, 1]} : vector<16x128xf32> to vector<8x128xf32>
    %c8_9 = arith.constant 8 : index
    %c128_10 = arith.constant 128 : index
    %13 = vector.load %arg6[%c8_9, %c128_10] : memref<24x256xf32, #tpu.memory_space<vmem>>, vector<8x128xf32>
    tpu.vector_store %arg6[%c8_9, %c128_10], %12 {strides = array<i32>} : memref<24x256xf32, #tpu.memory_space<vmem>>, vector<8x128xf32>,
    %14 = vector.extract_strided_slice %3 {offsets = [8, 0], sizes = [8, 128], strides = [1, 1]} : vector<16x128xf32> to vector<8x128xf32>
    %c16_11 = arith.constant 16 : index
    %c128_12 = arith.constant 128 : index
    %15 = vector.load %arg6[%c16_11, %c128_12] : memref<24x256xf32, #tpu.memory_space<vmem>>, vector<8x128xf32>
    tpu.vector_store %arg6[%c16_11, %c128_12], %14 {strides = array<i32>} : memref<24x256xf32, #tpu.memory_space<vmem>>, vector<8x128xf32>,
    %c0_13 = arith.constant 0 : index
    %c0_14 = arith.constant 0 : index
    %16 = vector.load %arg3[%c0_13, %c0_14] : memref<32x24xf32, #tpu.memory_space<vmem>>, vector<32x24xf32>
    %c0_15 = arith.constant 0 : index
    %c0_16 = arith.constant 0 : index
    %17 = vector.load %arg6[%c0_15, %c0_16] : memref<24x256xf32, #tpu.memory_space<vmem>>, vector<24x256xf32>
    %cst_17 = arith.constant dense<0.000000e+00> : vector<32x256xf32>
    %18 = tpu.matmul %16, %17, %cst_17 {dimension_numbers = #tpu.dot_dimension_numbers<[1], [0], [0], [1], [0, 0, 1, 1], [], []>} : vector<32x24xf32>, vector<24x256xf32>, vector<32x256xf32> -> vector<32x256xf32>
    %c0_18 = arith.constant 0 : index
    %c0_19 = arith.constant 0 : index
    %19 = vector.load %arg4[%c0_18, %c0_19] : memref<32x1xf32, #tpu.memory_space<vmem>>, vector<32x1xf32>
    %20 = vector.broadcast %19 : vector<32x1xf32> to vector<32x256xf32>
    %21 = arith.addf %18, %20 : vector<32x256xf32>
    %cst_20 = arith.constant 0.000000e+00 : f32
    %22 = vector.broadcast %cst_20 : f32 to vector<32x256xf32>
    %23 = arith.maximumf %21, %22 : vector<32x256xf32>
    %c0_21 = arith.constant 0 : index
    %c0_22 = arith.constant 0 : index
    %24 = vector.load %arg5[%c0_21, %c0_22] : memref<32x256xf32, #tpu.memory_space<vmem>>, vector<32x256xf32>
    tpu.vector_store %arg5[%c0_21, %c0_22], %23 {strides = array<i32>} : memref<32x256xf32, #tpu.memory_space<vmem>>, vector<32x256xf32>,
    return
  }
  func.func @transform_0(%arg0: i32) -> (i32, i32) {
    %c0_i32 = arith.constant 0 : i32
    %c0_i32_0 = arith.constant 0 : i32
    return %arg0, %c0_i32 : i32, i32
  }
  func.func @transform_1(%arg0: i32) -> (i32, i32) {
    %c0_i32 = arith.constant 0 : i32
    %c0_i32_0 = arith.constant 0 : i32
    %c0_i32_1 = arith.constant 0 : i32
    return %c0_i32, %c0_i32_0 : i32, i32
  }
  func.func @transform_2(%arg0: i32) -> (i32, i32) {
    %c0_i32 = arith.constant 0 : i32
    %c0_i32_0 = arith.constant 0 : i32
    %c0_i32_1 = arith.constant 0 : i32
    return %c0_i32, %c0_i32_0 : i32, i32
  }
  func.func @transform_3(%arg0: i32) -> (i32, i32) {
    %c0_i32 = arith.constant 0 : i32
    %c0_i32_0 = arith.constant 0 : i32
    %c0_i32_1 = arith.constant 0 : i32
    return %c0_i32, %c0_i32_0 : i32, i32
  }
  func.func @transform_4(%arg0: i32) -> (i32, i32) {
    %c0_i32 = arith.constant 0 : i32
    %c0_i32_0 = arith.constant 0 : i32
    return %c0_i32, %arg0 : i32, i32
  }
}

</mosaic_0001>

<bundles_post_ra>
// kernel: tpu_custom_call.1
= control target key start
LH: loop header
LB: loop body
LE: loop exit
PB: predicated region body
PF: predicated region fallthrough
CT: control target
= control target key end

     0   :  { %9 = vsyncpa [#allocation4], 0  ;;  %s389_s0 = inlined_call_operand.vmem [shape: f32[16,128], index: 0, kind: input, shape index: {}]   ;;  %s390_s1 = inlined_call_operand.hbm [shape: f32[128,128], index: 1, kind: input, shape index: {}]   ;;  %s391_s2 = inlined_call_operand.vmem [shape: f32[32,24], index: 2, kind: input, shape index: {}]   ;;  %s392_s3 = inlined_call_operand.vmem [shape: f32[32,1], index: 3, kind: input, shape index: {}]   ;;  %s393_s4 = inlined_call_operand.hbm [shape: f32[32,256], index: 4, kind: output, shape index: {}]  }
   0x1   :  { %10 = vsyncpa [#allocation5], 0  ;;  %s17_s17 = sshll.u32 %s390_s1, 4  ;;  %s313_s18 = smov [#allocation3]   ;;  %s18_s17 = int_to_ptr.hbm [resolvable:$true] %s17_s17 }
   0x2   :  { %s19_s19 = sshll.u32 %s313_s18, 4  ;;  %s314_s20 = smov 128   ;;  %s20_s19 = int_to_ptr.vmem [resolvable:$true] %s19_s19 }
   0x3   :  { %s315_s21 = smov 8  }
   0x4   :  { %25 = dma.hbm_to_vmem [thread:$0]  %s18_s17, 2048, %s20_s19, [#allocation4], %s314_s20, %s314_s20, %s315_s21  }
   0x5   :  { %309 = dma.done.wait [#allocation4], 2048  }
   0x6   :  { %310 = vsyncadd [#allocation4], 4294965248  ;;  %v49_v0 = vld [vmem:[#allocation3 + $0x78] sm:$0xff]  ;;  %v48_v1 = vld [vmem:[#allocation3 + $0x70] sm:$0xff]  ;;  %v316_v20 = vmov 0   ;;  %vm138_vm0 = vcmask 195584  }
   0x7   :  { %52 = vmatpush.msra.mxu0 %v49_v0  ;;  %75 = vmatpush.msra.mxu1 %v49_v0  ;;  %v47_v2 = vld [vmem:[#allocation3 + $0x68] sm:$0xff]  ;;  %v46_v3 = vld [vmem:[#allocation3 + $0x60] sm:$0xff]  ;;  %v45_v4 = vld [vmem:[#allocation3 + $0x58] sm:$0xff]  ;;  %s231_s16 = sshll.u32 %s393_s4, 4  ;;  %s318_s17 = smov 256   ;;  %s232_s16 = int_to_ptr.hbm [resolvable:$true] %s231_s16 }
   0x8   :  { %v44_v5 = vld [vmem:[#allocation3 + $0x50] sm:$0xff]  ;;  %v43_v6 = vld [vmem:[#allocation3 + $0x48] sm:$0xff]  ;;  %v42_v7 = vld [vmem:[#allocation3 + $0x40] sm:$0xff]  ;;  %259 = vset.pattern.permute.xlu0 %v316_v20  ;;  %260 = vset.pattern.permute.xlu1 %v316_v20  ;;  %s319_s18 = smov 16  }
   0x9   :  { %53 = vmatpush.msra.mxu0 %v48_v1  ;;  %76 = vmatpush.msra.mxu1 %v48_v1  ;;  %v41_v8 = vld [vmem:[#allocation3 + $0x38] sm:$0xff]  ;;  %v40_v9 = vld [vmem:[#allocation3 + $0x30] sm:$0xff]  ;;  %v39_v10 = vld [vmem:[#allocation3 + $0x28] sm:$0xff] }
   0xa   :  { %v38_v11 = vld [vmem:[#allocation3 + $0x20] sm:$0xff]  ;;  %v37_v12 = vld [vmem:[#allocation3 + $0x18] sm:$0xff]  ;;  %v36_v13 = vld [vmem:[#allocation3 + $0x10] sm:$0xff] }
   0xb   :  { %54 = vmatpush.msra.mxu0 %v47_v2  ;;  %77 = vmatpush.msra.mxu1 %v47_v2  ;;  %v35_v14 = vld [vmem:[#allocation3 + $0x8] sm:$0xff]  ;;  %v34_v15 = vld [vmem:[#allocation3] sm:$0xff]  ;;  %v116_v24 = vld [vmem:[%s392_s3 + $0x10] sm:$0xff] }
   0xc   :  { %v50_v16 = vld [vmem:[%s389_s0] sm:$0xff]  ;;  %v51_v17 = vld [vmem:[%s389_s0 + $0x8] sm:$0xff]  ;;  %130 = vperm.xlu1 %260, %v116_v24   ;;  %v117_v28 = vld [vmem:[%s392_s3 + $0x18] sm:$0xff] }
   0xd   :  { %55 = vmatpush.msra.mxu0 %v46_v3  ;;  %78 = vmatpush.msra.mxu1 %v46_v3  ;;  %v114_v21 = vld [vmem:[%s392_s3] sm:$0xff]  ;;  %v115_v25 = vld [vmem:[%s392_s3 + $0x8] sm:$0xff]  ;;  %v106_v29 = vld [vmem:[%s391_s2 + $0x10] sm:$0xff] }
   0xe   :  { %120 = vperm.xlu0 %259, %v114_v21   ;;  %v104_v23 = vld [vmem:[%s391_s2] sm:$0xff]  ;;  %v105_v27 = vld [vmem:[%s391_s2 + $0x8] sm:$0xff]  ;;  %v107_v30 = vld [vmem:[%s391_s2 + $0x18] sm:$0xff]  ;;  %s317_s2 = smov [#allocation6]  }
   0xf   :  { %56 = vmatpush.msra.mxu0 %v45_v4  ;;  %79 = vmatpush.msra.mxu1 %v45_v4  ;;  %s229_s3 = sshll.u32 %s317_s2, 4  ;;  %s230_s3 = int_to_ptr.vmem [resolvable:$true] %s229_s3 }
  0x11   :  { %57 = vmatpush.msra.mxu0 %v44_v5  ;;  %80 = vmatpush.msra.mxu1 %v44_v5 }
  0x13   :  { %58 = vmatpush.msra.mxu0 %v43_v6  ;;  %81 = vmatpush.msra.mxu1 %v43_v6 }
  0x14   :  { %135 = vperm.xlu1 %260, %v117_v28  }
  0x15   :  { %59 = vmatpush.msra.mxu0 %v42_v7  ;;  %82 = vmatpush.msra.mxu1 %v42_v7 }
  0x16   :  { %125 = vperm.xlu0 %259, %v115_v25  }
  0x17   :  { %60 = vmatpush.msra.mxu0 %v41_v8  ;;  %83 = vmatpush.msra.mxu1 %v41_v8 }
  0x19   :  { %61 = vmatpush.msra.mxu0 %v40_v9  ;;  %84 = vmatpush.msra.mxu1 %v40_v9 }
  0x1b   :  { %62 = vmatpush.msra.mxu0 %v39_v10  ;;  %85 = vmatpush.msra.mxu1 %v39_v10 }
  0x1d   :  { %63 = vmatpush.msra.mxu0 %v38_v11  ;;  %86 = vmatpush.msra.mxu1 %v38_v11 }
  0x1f   :  { %64 = vmatpush.msra.mxu0 %v37_v12  ;;  %87 = vmatpush.msra.mxu1 %v37_v12 }
  0x21   :  { %65 = vmatpush.msra.mxu0 %v36_v13  ;;  %88 = vmatpush.msra.mxu1 %v36_v13 }
  0x23   :  { %66 = vmatpush.msra.mxu0 %v35_v14  ;;  %89 = vmatpush.msra.mxu1 %v35_v14 }
  0x25   :  { %67 = vmatpush.msra.mxu0 %v34_v15  ;;  %90 = vmatpush.msra.mxu1 %v34_v15 }
  0x26   :  { %68 = vmatmul.f32.vlgmr.msra.gmra.mxu0 %v50_v16 }
  0x2e   :  { %71 = vmatmul.f32.gmra.mxu0 %v51_v17 }
  0x7e   :  { %v131_v42 = vpop.permute.xlu1 %130 }
  0x80   :  { %v121_v31 = vpop.permute.xlu0 %120 }
  0x86   :  { %v136_v49 = vpop.permute.xlu1 %135 }
  0x88   :  { %v126_v35 = vpop.permute.xlu0 %125 }
  0xa3   :  { %v69_v18 = vpop.f32.mrf.mxu0 }
  0xa4   :  { %91 = vmatmul.f32.vlgmr.msra.gmra.mxu1 %v69_v18 }
  0xab   :  { %v72_v19 = vpop.f32.mrf.mxu0 }
  0xac   :  { %94 = vmatmul.f32.gmra.mxu1 %v72_v19 }
 0x121   :  { %v92_v22 = vpop.f32.mrf.mxu1 }
 0x122   :  { %164 = vmatpush.msra.mxu2 %v92_v22 }
 0x124   :  { %165 = vmatpush.msra.mxu2 %v69_v18 }
 0x126   :  { %166 = vmatpush.msra.mxu2 %v50_v16 }
 0x127   :  { %244 = vmatmul.msk.f32.vlgmr.msra.gmra.mxu2 %vm138_vm0, %v104_v23 }
 0x129   :  { %v95_v26 = vpop.f32.mrf.mxu1 }
 0x12a   :  { %193 = vmatpush.msra.mxu3 %v95_v26 }
 0x12c   :  { %194 = vmatpush.msra.mxu3 %v72_v19 }
 0x12e   :  { %195 = vmatpush.msra.mxu3 %v51_v17 }
 0x12f   :  { %245 = vmatmul.msk.f32.gmra.mxu2 %vm138_vm0, %v105_v27  ;;  %248 = vmatmul.msk.f32.vlgmr.msra.gmra.mxu3 %vm138_vm0, %v104_v23 }
 0x137   :  { %246 = vmatmul.msk.f32.gmra.mxu2 %vm138_vm0, %v106_v29  ;;  %249 = vmatmul.msk.f32.gmra.mxu3 %vm138_vm0, %v105_v27 }
 0x13f   :  { %247 = vmatmul.msk.f32.gmra.mxu2 %vm138_vm0, %v107_v30  ;;  %250 = vmatmul.msk.f32.gmra.mxu3 %vm138_vm0, %v106_v29 }
 0x147   :  { %251 = vmatmul.msk.f32.gmra.mxu3 %vm138_vm0, %v107_v30 }
 0x1aa   :  { %v168_v32 = vpop.f32.mrf.mxu2 }
 0x1ab   :  { %v169_v33 = vadd.f32 %v168_v32, %v121_v31 }
 0x1ad   :  { %v209_v34 = vmax.f32 %v169_v33, 0.0 }
 0x1af   :  { %217 = vst [vmem:[#allocation6] sm:$0xff] %v209_v34 }
 0x1b2   :  { %v171_v36 = vpop.f32.mrf.mxu2  ;;  %v197_v37 = vpop.f32.mrf.mxu3 }
 0x1b3   :  { %v198_v38 = vadd.f32 %v197_v37, %v121_v31  ;;  %v172_v39 = vadd.f32 %v171_v36, %v126_v35 }
 0x1b5   :  { %v210_v40 = vmax.f32 %v198_v38, 0.0  ;;  %v211_v41 = vmax.f32 %v172_v39, 0.0 }
 0x1b7   :  { %218 = vst [vmem:[#allocation6 + $0x8] sm:$0xff] %v210_v40 }
 0x1b8   :  { %219 = vst [vmem:[#allocation6 + $0x10] sm:$0xff] %v211_v41 }
 0x1ba   :  { %v174_v43 = vpop.f32.mrf.mxu2  ;;  %v200_v44 = vpop.f32.mrf.mxu3 }
 0x1bb   :  { %v175_v45 = vadd.f32 %v174_v43, %v131_v42  ;;  %v201_v46 = vadd.f32 %v200_v44, %v126_v35 }
 0x1bd   :  { %v213_v47 = vmax.f32 %v175_v45, 0.0  ;;  %v212_v48 = vmax.f32 %v201_v46, 0.0 }
 0x1bf   :  { %221 = vst [vmem:[#allocation6 + $0x20] sm:$0xff] %v213_v47 }
 0x1c0   :  { %220 = vst [vmem:[#allocation6 + $0x18] sm:$0xff] %v212_v48 }
 0x1c2   :  { %v177_v50 = vpop.f32.mrf.mxu2  ;;  %v203_v51 = vpop.f32.mrf.mxu3 }
 0x1c3   :  { %v178_v52 = vadd.f32 %v177_v50, %v136_v49  ;;  %v204_v53 = vadd.f32 %v203_v51, %v131_v42 }
 0x1c5   :  { %v215_v54 = vmax.f32 %v178_v52, 0.0  ;;  %v214_v55 = vmax.f32 %v204_v53, 0.0 }
 0x1c7   :  { %223 = vst [vmem:[#allocation6 + $0x30] sm:$0xff] %v215_v54 }
 0x1c8   :  { %222 = vst [vmem:[#allocation6 + $0x28] sm:$0xff] %v214_v55 }
 0x1ca   :  { %v206_v56 = vpop.f32.mrf.mxu3 }
 0x1cb   :  { %v207_v57 = vadd.f32 %v206_v56, %v136_v49 }
 0x1cd   :  { %v216_v58 = vmax.f32 %v207_v57, 0.0 }
 0x1cf   :  { %224 = vst [vmem:[#allocation6 + $0x38] sm:$0xff] %v216_v58 }
 0x1d0   :  { %237 = dma.vmem_to_hbm [thread:$0]  %s230_s3, 1024, %s232_s16, [#allocation5], %s318_s17, %s318_s17, %s319_s18  }
 0x1d1   :  { %311 = dma.done.wait [#allocation5], 1024  }
 0x1d2   :  { %312 = vsyncadd [#allocation5], 4294966272 }
 0x1d3   :  { %242 = vsyncpa [#allocation4], 1 }
 0x1d4   :  { %243 = vsyncpa [#allocation5], 1 }

</bundles_post_ra>
